<compile_context>
chip_gen: v6e
topology: v6e:2x2x1
jax: 0.10.0
libtpu: 0.0.40
codegen_flags: <defaults>
</compile_context>

<pallas_src>
import functools

import jax
import jax.numpy as jnp
from jax.experimental import pallas as pl
from jax.experimental.pallas import tpu as pltpu


def _critic_mlp_kernel(xT_ref, w1_ref, b1_ref, w2_ref, b2_ref, w3_ref, b3_ref,
                       out_ref, *, use_relu: bool, bf16_matmul: bool):
    """Fused forward pass for one batch tile (batch on the lane axis).

    xT_ref : (D_in, tb)  VMEM   input columns
    w1_ref : (H, D_in)   VMEM   b1_ref: (H, 1)
    w2_ref : (H, H)      VMEM   b2_ref: (H, 1)
    w3_ref : (H, 1)      VMEM   (fc3 weight as a column)
    b3_ref : (1,)        SMEM   scalar bias
    out_ref: (1, tb)     VMEM   lane-dense value row
    """
    act = (lambda v: jnp.maximum(v, 0.0)) if use_relu else jnp.tanh

    xT = xT_ref[...]
    w1 = w1_ref[...]
    w2 = w2_ref[...]
    if bf16_matmul:
        xT = xT.astype(jnp.bfloat16)
        w1 = w1.astype(jnp.bfloat16)
        w2 = w2.astype(jnp.bfloat16)

    # fc1: (H, D_in) @ (D_in, tb) -> (H, tb), f32 accumulation on the MXU.
    h1 = jnp.dot(w1, xT, preferred_element_type=jnp.float32)
    h1 = act(h1 + b1_ref[...])                 # bias column broadcasts over lanes

    # fc2: (H, H) @ (H, tb) -> (H, tb)
    h1_in = h1.astype(jnp.bfloat16) if bf16_matmul else h1
    h2 = jnp.dot(w2, h1_in, preferred_element_type=jnp.float32)
    h2 = act(h2 + b2_ref[...])

    # fc3 (H -> 1): VPU multiply + sublane reduce instead of a 3rd MXU matmul.
    v = jnp.sum(h2 * w3_ref[...], axis=0, keepdims=True) + b3_ref[0]   # (1, tb)
    out_ref[...] = v.astype(out_ref.dtype)


def critic_mlp_forward(x, params, *, use_relu=False, bf16_matmul=False,
                       tb_cap=1024):
    """x: [B, D_in] float32. params: dict (torch-layout weights). Returns [B, 1]."""
    B, D_in = x.shape
    H = params["w1"].shape[0]

    # Collapse the grid: one step for small batches; tile only for huge B.
    tb = B if B <= tb_cap else tb_cap
    assert B % tb == 0, "batch must be divisible by the batch tile"
    n_tiles = B // tb

    # VMEM guard: all weights stay resident across grid steps (~2x buffering).
    vmem_estimate = 4 * 2 * (D_in * tb + H * D_in + H * H + 3 * H + tb)
    assert vmem_estimate < 48 * 1024 * 1024, (
        "hidden dim too large for full VMEM residency of w2")
    # TODO(synk): for mlp_hidden_dim >= ~2k, tile w2 over a reduction grid axis
    # instead of full residency (v7x only has 64 MiB physical VMEM).

    xT = x.T  # (D_in, B): batch on lanes -> lane-dense compute and output

    kernel = functools.partial(_critic_mlp_kernel, use_relu=use_relu,
                               bf16_matmul=bf16_matmul)

    out_row = pl.pallas_call(
        kernel,
        out_shape=jax.ShapeDtypeStruct((1, B), jnp.float32),
        grid_spec=pltpu.PrefetchScalarGridSpec(
            num_scalar_prefetch=0,
            grid=(n_tiles,),
            in_specs=[
                pl.BlockSpec((D_in, tb), lambda i: (0, i)),   # x columns tile
                pl.BlockSpec((H, D_in), lambda i: (0, 0)),    # w1 (resident)
                pl.BlockSpec((H, 1), lambda i: (0, 0)),       # b1
                pl.BlockSpec((H, H), lambda i: (0, 0)),       # w2 (resident)
                pl.BlockSpec((H, 1), lambda i: (0, 0)),       # b2
                pl.BlockSpec((H, 1), lambda i: (0, 0)),       # w3 column
                pl.BlockSpec(memory_space=pltpu.MemorySpace.SMEM),  # b3 scalar
            ],
            out_specs=pl.BlockSpec((1, tb), lambda i: (0, i)),
        ),
        compiler_params=pltpu.CompilerParams(
            dimension_semantics=("arbitrary",),      # don't megacore-shard a µs kernel
            vmem_limit_bytes=48 * 1024 * 1024,
        ),
    )(xT, params["w1"], params["b1"], params["w2"], params["b2"],
      params["w3c"], params["b3"])

    return out_row.reshape(B, 1)


def orthogonal_init(key, out_dim, in_dim, gain=1.0):
    """Matches torch.nn.init.orthogonal_ semantics; returns (out_dim, in_dim)."""
    a = jax.random.normal(key, (out_dim, in_dim), dtype=jnp.float32)
    flip = out_dim < in_dim
    if flip:
        a = a.T
    q, r = jnp.linalg.qr(a)
    d = jnp.diag(r)
    q = q * jnp.where(d >= 0, 1.0, -1.0)[None, :]   # sign fix, robust to d == 0
    w = q.T if flip else q
    return gain * w


def init_params(key, critic_input_dim, mlp_hidden_dim):
    k1, k2, k3 = jax.random.split(key, 3)
    H = mlp_hidden_dim
    return {
        "w1": orthogonal_init(k1, H, critic_input_dim),   # == torch fc1.weight
        "b1": jnp.zeros((H, 1), jnp.float32),
        "w2": orthogonal_init(k2, H, H),                  # == torch fc2.weight
        "b2": jnp.zeros((H, 1), jnp.float32),
        "w3c": orthogonal_init(k3, 1, H).T,               # (H, 1) == fc3.weight.T
        "b3": jnp.zeros((1,), jnp.float32),
    }


def critic_mlp_ref(x, params, *, use_relu=False):
    act = (lambda v: jnp.maximum(v, 0.0)) if use_relu else jnp.tanh
    h1 = act(x @ params["w1"].T + params["b1"][:, 0])
    h2 = act(h1 @ params["w2"].T + params["b2"][:, 0])
    return h2 @ params["w3c"] + params["b3"]


if __name__ == "__main__":
    key = jax.random.PRNGKey(0)
    k_x, k_p = jax.random.split(key)

    batch = 16
    critic_input_dim = 16
    mlp_hidden_dim = 32
    use_relu = False  # args.use_relu = 0 -> Tanh

    x = jax.random.normal(k_x, (batch, critic_input_dim), dtype=jnp.float32)
    params = init_params(k_p, critic_input_dim, mlp_hidden_dim)

    # f32 path (matches the PyTorch module's numerics).
    value = critic_mlp_forward(x, params, use_relu=use_relu)
    value = jax.block_until_ready(value)
    ref = critic_mlp_ref(x, params, use_relu=use_relu)
    assert value.shape == (batch, 1)
    assert jnp.allclose(value, ref, atol=1e-5, rtol=1e-5), "mismatch vs reference"

    # bf16-matmul path (f32 accumulation) — looser tolerance smoke test.
    value_bf16 = critic_mlp_forward(x, params, use_relu=use_relu,
                                    bf16_matmul=True)
    value_bf16 = jax.block_until_ready(value_bf16)
    assert jnp.allclose(value_bf16, ref, atol=1e-1), "bf16 path diverged"

    print("KERNEL_OK")
</pallas_src>

<mosaic_0001>
module attributes {stable_mosaic.version = 11 : i64} {
  func.func @_critic_mlp_kernel(%arg0: i32, %arg1: memref<16x16xf32, #tpu.memory_space<vmem>>, %arg2: memref<32x16xf32, #tpu.memory_space<vmem>>, %arg3: memref<32x1xf32, #tpu.memory_space<vmem>>, %arg4: memref<32x32xf32, #tpu.memory_space<vmem>>, %arg5: memref<32x1xf32, #tpu.memory_space<vmem>>, %arg6: memref<32x1xf32, #tpu.memory_space<vmem>>, %arg7: memref<1xf32, #tpu.memory_space<smem>>, %arg8: memref<1x16xf32, #tpu.memory_space<vmem>>) attributes {dimension_semantics = [#tpu.dimension_semantics<arbitrary>], iteration_bounds = array<i64: 1>, scalar_prefetch = 0 : i64, scratch_operands = 0 : i64, tpu.core_type = #tpu.core_type<tc>, window_params = [{transform_indices = @transform_0, window_bounds = array<i64: 16, 16>}, {pipeline_mode = #tpu.pipeline_mode<synchronous>, transform_indices = @transform_1, window_bounds = array<i64: 32, 16>}, {pipeline_mode = #tpu.pipeline_mode<synchronous>, transform_indices = @transform_2, window_bounds = array<i64: 32, 1>}, {pipeline_mode = #tpu.pipeline_mode<synchronous>, transform_indices = @transform_3, window_bounds = array<i64: 32, 32>}, {pipeline_mode = #tpu.pipeline_mode<synchronous>, transform_indices = @transform_4, window_bounds = array<i64: 32, 1>}, {pipeline_mode = #tpu.pipeline_mode<synchronous>, transform_indices = @transform_5, window_bounds = array<i64: 32, 1>}, {transform_indices = @transform_6, window_bounds = array<i64: 1>}, {transform_indices = @transform_7, window_bounds = array<i64: 1, 16>}]} {
    %c0 = arith.constant 0 : index
    %c0_0 = arith.constant 0 : index
    %0 = vector.load %arg1[%c0, %c0_0] : memref<16x16xf32, #tpu.memory_space<vmem>>, vector<16x16xf32>
    %c0_1 = arith.constant 0 : index
    %c0_2 = arith.constant 0 : index
    %1 = vector.load %arg2[%c0_1, %c0_2] : memref<32x16xf32, #tpu.memory_space<vmem>>, vector<32x16xf32>
    %c0_3 = arith.constant 0 : index
    %c0_4 = arith.constant 0 : index
    %2 = vector.load %arg4[%c0_3, %c0_4] : memref<32x32xf32, #tpu.memory_space<vmem>>, vector<32x32xf32>
    %cst = arith.constant dense<0.000000e+00> : vector<32x16xf32>
    %3 = tpu.matmul %1, %0, %cst {dimension_numbers = #tpu.dot_dimension_numbers<[1], [0], [0], [1], [0, 0, 1, 1], [], []>} : vector<32x16xf32>, vector<16x16xf32>, vector<32x16xf32> -> vector<32x16xf32>
    %c0_5 = arith.constant 0 : index
    %c0_6 = arith.constant 0 : index
    %4 = vector.load %arg3[%c0_5, %c0_6] : memref<32x1xf32, #tpu.memory_space<vmem>>, vector<32x1xf32>
    %5 = vector.broadcast %4 : vector<32x1xf32> to vector<32x16xf32>
    %6 = arith.addf %3, %5 : vector<32x16xf32>
    %7 = math.tanh %6 : vector<32x16xf32>
    %cst_7 = arith.constant dense<0.000000e+00> : vector<32x16xf32>
    %8 = tpu.matmul %2, %7, %cst_7 {dimension_numbers = #tpu.dot_dimension_numbers<[1], [0], [0], [1], [0, 0, 1, 1], [], []>} : vector<32x32xf32>, vector<32x16xf32>, vector<32x16xf32> -> vector<32x16xf32>
    %c0_8 = arith.constant 0 : index
    %c0_9 = arith.constant 0 : index
    %9 = vector.load %arg5[%c0_8, %c0_9] : memref<32x1xf32, #tpu.memory_space<vmem>>, vector<32x1xf32>
    %10 = vector.broadcast %9 : vector<32x1xf32> to vector<32x16xf32>
    %11 = arith.addf %8, %10 : vector<32x16xf32>
    %12 = math.tanh %11 : vector<32x16xf32>
    %c0_10 = arith.constant 0 : index
    %c0_11 = arith.constant 0 : index
    %13 = vector.load %arg6[%c0_10, %c0_11] : memref<32x1xf32, #tpu.memory_space<vmem>>, vector<32x1xf32>
    %14 = vector.broadcast %13 : vector<32x1xf32> to vector<32x16xf32>
    %15 = arith.mulf %12, %14 : vector<32x16xf32>
    %cst_12 = arith.constant dense<0.000000e+00> : vector<16xf32>
    %16 = vector.multi_reduction <add>, %15, %cst_12 [0] : vector<32x16xf32> to vector<16xf32>
    %17 = vector.shape_cast %16 : vector<16xf32> to vector<1x16xf32>
    %c0_13 = arith.constant 0 : index
    %18 = memref.load %arg7[%c0_13] : memref<1xf32, #tpu.memory_space<smem>>
    %19 = vector.broadcast %18 : f32 to vector<1x16xf32>
    %20 = arith.addf %17, %19 : vector<1x16xf32>
    %c0_14 = arith.constant 0 : index
    %c0_15 = arith.constant 0 : index
    %21 = vector.load %arg8[%c0_14, %c0_15] : memref<1x16xf32, #tpu.memory_space<vmem>>, vector<1x16xf32>
    tpu.vector_store %arg8[%c0_14, %c0_15], %20 {strides = array<i32>} : memref<1x16xf32, #tpu.memory_space<vmem>>, vector<1x16xf32>,
    return
  }
  func.func @transform_0(%arg0: i32) -> (i32, i32) {
    %c0_i32 = arith.constant 0 : i32
    %c0_i32_0 = arith.constant 0 : i32
    return %c0_i32, %arg0 : i32, i32
  }
  func.func @transform_1(%arg0: i32) -> (i32, i32) {
    %c0_i32 = arith.constant 0 : i32
    %c0_i32_0 = arith.constant 0 : i32
    %c0_i32_1 = arith.constant 0 : i32
    return %c0_i32, %c0_i32_0 : i32, i32
  }
  func.func @transform_2(%arg0: i32) -> (i32, i32) {
    %c0_i32 = arith.constant 0 : i32
    %c0_i32_0 = arith.constant 0 : i32
    %c0_i32_1 = arith.constant 0 : i32
    return %c0_i32, %c0_i32_0 : i32, i32
  }
  func.func @transform_3(%arg0: i32) -> (i32, i32) {
    %c0_i32 = arith.constant 0 : i32
    %c0_i32_0 = arith.constant 0 : i32
    %c0_i32_1 = arith.constant 0 : i32
    return %c0_i32, %c0_i32_0 : i32, i32
  }
  func.func @transform_4(%arg0: i32) -> (i32, i32) {
    %c0_i32 = arith.constant 0 : i32
    %c0_i32_0 = arith.constant 0 : i32
    %c0_i32_1 = arith.constant 0 : i32
    return %c0_i32, %c0_i32_0 : i32, i32
  }
  func.func @transform_5(%arg0: i32) -> (i32, i32) {
    %c0_i32 = arith.constant 0 : i32
    %c0_i32_0 = arith.constant 0 : i32
    %c0_i32_1 = arith.constant 0 : i32
    return %c0_i32, %c0_i32_0 : i32, i32
  }
  func.func @transform_6(%arg0: i32) -> i32 {
    %c0_i32 = arith.constant 0 : i32
    %c0_i32_0 = arith.constant 0 : i32
    return %c0_i32 : i32
  }
  func.func @transform_7(%arg0: i32) -> (i32, i32) {
    %c0_i32 = arith.constant 0 : i32
    %c0_i32_0 = arith.constant 0 : i32
    return %c0_i32, %arg0 : i32, i32
  }
}

</mosaic_0001>

<bundles_post_ra>
// kernel: tpu_custom_call.1
= control target key start
LH: loop header
LB: loop body
LE: loop exit
PB: predicated region body
PF: predicated region fallthrough
CT: control target
= control target key end

     0   :  { %vm62_vm0 = vcmask 130048   ;;  %v438_v4 = vmov 0   ;;  %s564_s0 = inlined_call_operand.vmem [shape: f32[16,16], index: 0, kind: input, shape index: {}]   ;;  %s565_s1 = inlined_call_operand.vmem [shape: f32[32,16], index: 1, kind: input, shape index: {}]   ;;  %s566_s2 = inlined_call_operand.vmem [shape: f32[32,1], index: 2, kind: input, shape index: {}]   ;;  %s567_s3 = inlined_call_operand.vmem [shape: f32[32,32], index: 3, kind: input, shape index: {}]   ;;  %s568_s4 = inlined_call_operand.vmem [shape: f32[32,1], index: 4, kind: input, shape index: {}]   ;;  %s569_s5 = inlined_call_operand.vmem [shape: f32[32,1], index: 5, kind: input, shape index: {}]   ;;  %s570_s6 = inlined_call_operand.<no memory space> [shape: f32[1], index: 6, kind: input, shape index: {}]   ;;  %s571_s7 = inlined_call_operand.hbm [shape: f32[1,16], index: 7, kind: output, shape index: {}]  }
   0x1   :  { %v29_v0 = vld [vmem:[%s564_s0 + $0x8] sm:$0xff]  ;;  %v28_v1 = vld [vmem:[%s564_s0] sm:$0xff]  ;;  %398 = vset.pattern.permute.xlu0 %v438_v4  ;;  %v41_v5 = vld [vmem:[%s566_s2 + $0x18] sm:$0xff]  ;;  %399 = vset.pattern.permute.xlu1 %v438_v4 }
   0x2   :  { %v30_v2 = vld [vmem:[%s565_s1] sm:$0xff]  ;;  %372 = vmatprep.subr.mxu0 %v29_v0  ;;  %v31_v3 = vld [vmem:[%s565_s1 + $0x8] sm:$0xff]  ;;  %v32_v7 = vld [vmem:[%s565_s1 + $0x10] sm:$0xff]  ;;  %59 = vperm.xlu0 %398, %v41_v5  }
   0x3   :  { %376 = vmatprep.mubr.msk.f32.mxu0 %vm62_vm0, %v30_v2  ;;  %373 = vmatpush3.msra.mxu0 %v29_v0  ;;  %v39_v6 = vld [vmem:[%s566_s2 + $0x8] sm:$0xff]  ;;  %v40_v8 = vld [vmem:[%s566_s2 + $0x10] sm:$0xff]  ;;  %v33_v9 = vld [vmem:[%s565_s1 + $0x18] sm:$0xff] }
   0x4   :  { %374 = vmatprep.subr.mxu0 %v28_v1  ;;  %49 = vperm.xlu1 %399, %v39_v6   ;;  %v38_v10 = vld [vmem:[%s566_s2] sm:$0xff] }
   0x5   :  { %375 = vmatpush3.msra.mxu0 %v28_v1 }
   0x6   :  { %377 = vmatmul.mubr.msk.f32.vlgmr.msra.gmra.mxu0 %vm62_vm0, %v31_v3 }
   0x7   :  { %379 = vmatprep.mubr.msk.f32.mxu0 %vm62_vm0, %v32_v7 }
   0x8   :  { %13 = vsyncpa [#allocation4], 0  ;;  %54 = vperm.xlu0 %398, %v40_v8   ;;  %v164_v11 = vld [vmem:[%s568_s4] sm:$0xff]  ;;  %44 = vperm.xlu1 %399, %v38_v10   ;;  %v165_v12 = vld [vmem:[%s568_s4 + $0x8] sm:$0xff]  ;;  %vm188_vm1 = vcmask 261120   ;;  %s439_s17 = smov [#allocation3]  }
   0x9   :  { %v166_v13 = vld [vmem:[%s568_s4 + $0x10] sm:$0xff]  ;;  %v167_v14 = vld [vmem:[%s568_s4 + $0x18] sm:$0xff]  ;;  %v290_v15 = vld [vmem:[%s569_s5] sm:$0xff]  ;;  %s342_s18 = sshll.u32 %s439_s17, 4  ;;  %vm334_vm2 = vcmask 122880   ;;  %s343_s18 = int_to_ptr.vmem [resolvable:$true] %s342_s18 }
   0xa   :  { %380 = vmatmul.mubr.msk.f32.gmra.mxu0 %vm62_vm0, %v33_v9  ;;  %v291_v16 = vld [vmem:[%s569_s5 + $0x8] sm:$0xff]  ;;  %v292_v17 = vld [vmem:[%s569_s5 + $0x10] sm:$0xff]  ;;  %v293_v18 = vld [vmem:[%s569_s5 + $0x18] sm:$0xff]  ;;  %s416_s19 = scalar_lea.vmem %s343_s18, 16  ;;  %s420_s20 = scalar_lea.vmem %s343_s18, 32 }
   0xb   :  { %v34_v19 = vld [vmem:[%s567_s3] sm:$0xff]  ;;  %v35_v36 = vld [vmem:[%s567_s3 + $0x8] sm:$0xff]  ;;  %v36_v37 = vld [vmem:[%s567_s3 + $0x10] sm:$0xff]  ;;  %p417_p0 = scmp.ne.s32.totalorder %s343_s18, %s416_s19  ;;  %p421_p1 = scmp.lt.s32.totalorder %s343_s18, %s343_s18 }
   0xc   :  { %170 = vperm.xlu0 %398, %v164_v11   ;;  %175 = vperm.xlu1 %399, %v165_v12   ;;  %v37_v38 = vld [vmem:[%s567_s3 + $0x18] sm:$0xff]  ;;  %v332_v11 = vstv %s570_s6  ;;  %p422_p2 = scmp.lt.s32.totalorder %s420_s20, %s416_s19 }
   0xd   :  { %390 = vmatprep.mubr.msk.f32.mxu1 %vm188_vm1, %v34_v19 }
   0xe   :  { %p423_p3 = por %p422_p2, %p421_p1 }
  0x10   :  { %180 = vperm.xlu0 %398, %v166_v13   ;;  %185 = vperm.xlu1 %399, %v167_v14   ;;  %p424_p4 = pnand %p423_p3, %p417_p0 }
  0x14   :  { %296 = vperm.xlu0 %398, %v290_v15   ;;  %301 = vperm.xlu1 %399, %v291_v16  }
  0x18   :  { %306 = vperm.xlu0 %398, %v292_v17   ;;  %311 = vperm.xlu1 %399, %v293_v18  }
  0x7d   :  { %v60_v20 = vpop.permute.xlu0 %59 }
  0x7f   :  { %v50_v22 = vpop.permute.xlu1 %49 }
  0x83   :  { %v55_v26 = vpop.permute.xlu0 %54  ;;  %v45_v30 = vpop.permute.xlu1 %44 }
  0x87   :  { %v176_v39 = vpop.permute.xlu1 %175  ;;  %v171_v40 = vpop.permute.xlu0 %170 }
  0x8b   :  { %v186_v45 = vpop.permute.xlu1 %185  ;;  %v181_v48 = vpop.permute.xlu0 %180 }
  0x8f   :  { %v297_v52 = vpop.permute.xlu0 %296  ;;  %v302_v53 = vpop.permute.xlu1 %301 }
  0x93   :  { %v307_v60 = vpop.permute.xlu0 %306  ;;  %v312_v61 = vpop.permute.xlu1 %311 }
  0xc6   :  { %v378_v21 = vpop.f32.mrf.mxu0 }
  0xc7   :  { %v147_v28 = vadd.f32 %v378_v21, %v50_v22 }
  0xc8   :  { %v141_v23 = vpop.f32.mrf.mxu0 }
  0xc9   :  { %v142_v31 = vadd.f32 %v141_v23, %v45_v30 }
  0xca   :  { %v381_v24 = vpop.f32.mrf.mxu0 }
  0xcb   :  { %v157_v25 = vadd.f32 %v381_v24, %v60_v20 }
  0xcc   :  { %v151_v27 = vpop.f32.mrf.mxu0 }
  0xcd   :  { %400 = vtanh.f32 %v157_v25  ;;  %v152_v29 = vadd.f32 %v151_v27, %v55_v26 }
  0xcf   :  { %402 = vtanh.f32 %v152_v29 }
  0xd0   :  { %404 = vtanh.f32 %v147_v28 }
  0xd1   :  { %406 = vtanh.f32 %v142_v31 }
  0xda   :  { %v401_v32 = vpop.eup %400 }
  0xdb   :  { %382 = vmatprep.subr.mxu1 %v401_v32 }
  0xdc   :  { %v403_v33 = vpop.eup %402  ;;  %383 = vmatpush3.msra.mxu1 %v401_v32 }
  0xdd   :  { %384 = vmatprep.subr.mxu1 %v403_v33  ;;  %v405_v34 = vpop.eup %404 }
  0xde   :  { %385 = vmatpush3.msra.mxu1 %v403_v33  ;;  %v407_v35 = vpop.eup %406 }
  0xdf   :  { %386 = vmatprep.subr.mxu1 %v405_v34 }
  0xe0   :  { %387 = vmatpush3.msra.mxu1 %v405_v34 }
  0xe1   :  { %388 = vmatprep.subr.mxu1 %v407_v35 }
  0xe2   :  { %389 = vmatpush3.msra.mxu1 %v407_v35 }
  0xe3   :  { %391 = vmatmul.mubr.msk.f32.vlgmr.msra.gmra.mxu1 %vm188_vm1, %v35_v36 }
  0xe4   :  { %393 = vmatprep.mubr.msk.f32.mxu1 %vm188_vm1, %v36_v37 }
  0xe7   :  { %394 = vmatmul.mubr.msk.f32.gmra.mxu1 %vm188_vm1, %v37_v38 }
 0x1a3   :  { %v392_v41 = vpop.f32.mrf.mxu1 }
 0x1a4   :  { %v273_v42 = vadd.f32 %v392_v41, %v176_v39 }
 0x1a5   :  { %v267_v43 = vpop.f32.mrf.mxu1 }
 0x1a6   :  { %408 = vtanh.f32 %v273_v42  ;;  %v268_v44 = vadd.f32 %v267_v43, %v171_v40 }
 0x1a7   :  { %v395_v46 = vpop.f32.mrf.mxu1 }
 0x1a8   :  { %410 = vtanh.f32 %v268_v44  ;;  %v283_v47 = vadd.f32 %v395_v46, %v186_v45 }
 0x1a9   :  { %v277_v49 = vpop.f32.mrf.mxu1 }
 0x1aa   :  { %412 = vtanh.f32 %v283_v47  ;;  %v278_v50 = vadd.f32 %v277_v49, %v181_v48 }
 0x1ac   :  { %414 = vtanh.f32 %v278_v50 }
 0x1b3   :  { %v409_v51 = vpop.eup %408 }
 0x1b4   :  { %v315_v55 = vmul.f32 %v409_v51, %v302_v53 }
 0x1b5   :  { %v411_v54 = vpop.eup %410 }
 0x1b6   :  { %v314_v56 = vmul.f32 %v411_v54, %v297_v52  ;;  %v319_v0 = vsel %vm62_vm0, %v315_v55, 0.0 }
 0x1b7   :  { %v413_v57 = vpop.eup %412 }
 0x1b8   :  { %v318_v58 = vsel %vm62_vm0, %v314_v56, 0.0  ;;  %v317_v63 = vmul.f32 %v413_v57, %v312_v61 }
 0x1b9   :  { %v415_v59 = vpop.eup %414  ;;  %v320_v1 = vadd.f32 %v319_v0, %v318_v58 }
 0x1ba   :  { %v316_v62 = vmul.f32 %v415_v59, %v307_v60  ;;  %v323_v4 = vsel %vm62_vm0, %v317_v63, 0.0 }
 0x1bc   :  { %v321_v2 = vsel %vm62_vm0, %v316_v62, 0.0 }
 0x1bd   :  { %v322_v3 = vadd.f32 %v321_v2, %v320_v1 }
 0x1bf   :  { %v324_v5 = vadd.f32 %v323_v4, %v322_v3 }
 0x1c1   :  { %v325_v6 = vrot.slane %v324_v5, 4 }
 0x1c3   :  { %v326_v7 = vadd.f32 %v325_v6, %v324_v5 }
 0x1c5   :  { %v327_v8 = vrot.slane %v326_v7, 2 }
 0x1c7   :  { %v328_v9 = vadd.f32 %v327_v8, %v326_v7 }
 0x1c9   :  { %v329_v10 = vrot.slane %v328_v9, 1 }
 0x1cb   :  { %v330_v12 = vadd.f32 %v329_v10, %v328_v9 }
 0x1cd   :  { %v333_v13 = vadd.f32 %v332_v11, %v330_v12 }
 0x1cf   :  { %335 = vst.msk [vmem:[#allocation3] sm:$0x1] %vm334_vm2, %v333_v13 }
 0x1d0   :  { %427 = shalt.err (!%p424_p4)
}
 0x1d1   :  { %345 = dma.vmem_to_hbm [thread:$0]  %s343_s18, 16, %s571_s7, [#allocation4]  }
 0x1d2   :  { %436 = dma.done.wait [#allocation4], 16  }
 0x1d3   :  { %437 = vsyncadd [#allocation4], 4294967280 }
 0x1d4   :  { %349 = vsyncpa [#allocation4], 1 }

</bundles_post_ra>
